<compile_context>
chip_gen: v6e
topology: v6e:2x2x1
jax: 0.10.0
libtpu: 0.0.40
codegen_flags: <defaults>
</compile_context>

<pallas_src>
import jax
import jax.numpy as jnp
from jax import lax
from jax.experimental import pallas as pl
from jax.experimental.pallas import tpu as pltpu


# -----------------------------------------------------------------------------
# Layout constants
# -----------------------------------------------------------------------------
C_PAD = 128          # lane-dense padded class dimension (C=7 -> 128 lanes)
SUBLANE = 8          # batch-row block size at real sizes
NEG_INF = -1e30      # bias for padded logit columns -> exp() underflows to 0
MATMUL_DTYPE = jnp.float32   # set jnp.bfloat16 at real BERT sizes (cast at the producer)


# -----------------------------------------------------------------------------
# Fused kernel (one batch-row block per grid step):
#   mask-gen -> masked mean pooling (per-row contraction) -> pooler dense+tanh
#   -> classifier Linear -> stable log-softmax (lane-dense [rows, 128] store)
# -----------------------------------------------------------------------------
def _fused_kernel(vl_ref, seq_ref, pw_ref, pb_ref, cw_ref, cb_ref, out_ref):
    rows, S, H = seq_ref.shape

    # --- attention mask, one pass:  mask[r, s] = 1.0  iff  s < valid_length[r]
    pos = lax.broadcasted_iota(jnp.int32, (rows, S), 1)
    mask = (pos < vl_ref[...]).astype(jnp.float32)                       # [rows, S]

    # --- fold the mean normalization into the mask (reciprocal on the EUP slot)
    denom = jnp.maximum(jnp.sum(mask, axis=-1, keepdims=True), 1.0)      # [rows, 1]
    scaled_mask = mask * pl.reciprocal(denom, approx=True)               # [rows, S]

    # --- masked mean pooling: per-row contraction over S.
    #     No [rows, rows*S] pooling matrix, no block-diagonal MXU waste.
    pooled = jnp.sum(seq_ref[...] * scaled_mask[:, :, None], axis=1)     # [rows, H] f32

    # --- BERT pooler dense + tanh (tanh goes to the EUP slot)
    pooler = jnp.tanh(
        jnp.dot(pooled.astype(pw_ref.dtype), pw_ref[...],
                preferred_element_type=jnp.float32) + pb_ref[...])       # [rows, H]

    # --- classifier + numerically stable log-softmax.
    #     Padded class columns carry a -1e30 bias -> excluded from max / exp-sum.
    logits = jnp.dot(pooler.astype(cw_ref.dtype), cw_ref[...],
                     preferred_element_type=jnp.float32) + cb_ref[...]   # [rows, C_PAD]
    m = jnp.max(logits, axis=-1, keepdims=True)
    shifted = logits - m
    lse = jnp.log(jnp.sum(jnp.exp(shifted), axis=-1, keepdims=True))
    out_ref[...] = shifted - lse                                         # lane-dense store


def fused_mask_pool_classifier(vl_col, seq, pool_w, pool_b2d, cls_w_pad, cls_b_pad,
                               *, rows):
    """vl_col: [B_pad, 1] i32; seq: [B_pad, S, H]; weights padded / pre-cast."""
    B_pad, S, H = seq.shape
    C_pad = cls_w_pad.shape[1]
    grid = (B_pad // rows,)
    return pl.pallas_call(
        _fused_kernel,
        out_shape=jax.ShapeDtypeStruct((B_pad, C_pad), jnp.float32),
        grid=grid,
        in_specs=[
            pl.BlockSpec((rows, 1), lambda i: (i, 0)),          # valid_length column
            pl.BlockSpec((rows, S, H), lambda i: (i, 0, 0)),    # embeddings block
            pl.BlockSpec((H, H), lambda i: (0, 0)),             # pooler weight
            pl.BlockSpec((1, H), lambda i: (0, 0)),             # pooler bias (f32)
            pl.BlockSpec((H, C_pad), lambda i: (0, 0)),         # classifier weight (padded)
            pl.BlockSpec((1, C_pad), lambda i: (0, 0)),         # classifier bias (padded, -1e30 fill)
        ],
        out_specs=pl.BlockSpec((rows, C_pad), lambda i: (i, 0)),
        compiler_params=pltpu.CompilerParams(
            # v7x: batch blocks shard across its 2 TensorCores; harmless on v5e/v6e.
            dimension_semantics=("parallel",),
            # TODO(synk): at real BERT sizes set vmem_limit_bytes explicitly and
            # sweep `rows` per generation (8-row blocks fit v7x's 64 MiB VMEM;
            # v6e/v5e can afford 2-4x larger blocks against 128 MiB).
        ),
    )(vl_col, seq, pool_w, pool_b2d, cls_w_pad, cls_b_pad)


# -----------------------------------------------------------------------------
# Synthetic deterministic "bert" backbone (external dependency in PyTorch).
# -----------------------------------------------------------------------------
class SyntheticBert:
    """Tiny stand-in for the external KoBERT backbone.

    - embed(): token + segment embedding lookup (plain JAX gather).
    - pool_w / pool_b: pooler dense parameters, consumed by the fused kernel.
    - __call__(): full pure-JAX forward (masked mean pool + tanh dense) used as
      the reference path for correctness checking.
    """

    def __init__(self, key, vocab_size, hidden_size):
        k1, k2, k3, k4 = jax.random.split(key, 4)
        self.word_emb = jax.random.normal(k1, (vocab_size, hidden_size), jnp.float32) * 0.02
        self.seg_emb = jax.random.normal(k2, (2, hidden_size), jnp.float32) * 0.02
        self.pool_w = jax.random.normal(k3, (hidden_size, hidden_size), jnp.float32) * 0.02
        self.pool_b = jax.random.normal(k4, (hidden_size,), jnp.float32) * 0.02

    def embed(self, input_ids, token_type_ids):
        return self.word_emb[input_ids] + self.seg_emb[token_type_ids]      # [B, S, H]

    def __call__(self, input_ids, token_type_ids, attention_mask):
        seq = self.embed(input_ids, token_type_ids)
        mask = attention_mask[..., None]
        denom = jnp.maximum(jnp.sum(mask, axis=1), 1.0)
        pooled = jnp.sum(seq * mask, axis=1) / denom
        pooler = jnp.tanh(jnp.dot(pooled, self.pool_w,
                                  precision=lax.Precision.HIGHEST) + self.pool_b)
        return seq, pooler


# -----------------------------------------------------------------------------
# BERTClassifier wrapper (mirrors the PyTorch module's forward semantics)
# -----------------------------------------------------------------------------
class BERTClassifier:
    def __init__(self, bert, hidden_size=32, num_classes=7, dr_rate=None, key=None):
        self.bert = bert
        self.hidden_size = hidden_size
        self.num_classes = num_classes
        self.dr_rate = dr_rate
        k1, k2 = jax.random.split(key if key is not None else jax.random.PRNGKey(0), 2)
        bound = 1.0 / (hidden_size ** 0.5)
        # classifier: Linear(hidden_size, num_classes); weight stored [H, C]
        self.cls_w = jax.random.uniform(k1, (hidden_size, num_classes),
                                        jnp.float32, -bound, bound)
        self.cls_b = jax.random.uniform(k2, (num_classes,), jnp.float32, -bound, bound)
        # Lane-dense padded copies for the kernel (done once at init).
        # Matmul operands pre-cast at the producer (no in-kernel astype);
        # biases stay f32 so the -1e30 padded-column trick and bias adds stay exact.
        self.cls_w_pad = (jnp.zeros((hidden_size, C_PAD), jnp.float32)
                          .at[:, :num_classes].set(self.cls_w)).astype(MATMUL_DTYPE)
        self.cls_b_pad = (jnp.full((1, C_PAD), NEG_INF, jnp.float32)
                          .at[0, :num_classes].set(self.cls_b))
        self.pool_w_mm = bert.pool_w.astype(MATMUL_DTYPE)
        self.pool_b2d = bert.pool_b.reshape(1, hidden_size).astype(jnp.float32)
        # TODO(synk): dropout (dr_rate) is a train-time op; this is the
        # eval-mode forward (equivalent to dr_rate=None).

    def gen_attention_mask(self, token_ids, valid_length):
        # Plain-jnp equivalent of the PyTorch loop (reference path only);
        # in forward() the mask is generated *inside* the fused Pallas kernel.
        B, S = token_ids.shape
        pos = jnp.arange(S, dtype=jnp.int32)[None, :]
        return (pos < valid_length.reshape(B, 1).astype(jnp.int32)).astype(jnp.float32)

    def forward(self, token_ids, valid_length, segment_ids):
        B, S = token_ids.shape
        # Embedding gather stays in plain JAX; seq is emitted directly in the
        # matmul dtype (cast at the producer -> halves HBM traffic when bf16).
        # TODO(synk): at real sizes fuse the gather via PrefetchScalarGridSpec
        # (token/segment ids as scalar-prefetch + pl.Element row index_map).
        seq = self.bert.embed(token_ids, segment_ids.astype(jnp.int32)).astype(MATMUL_DTYPE)
        vl_col = valid_length.astype(jnp.int32).reshape(B, 1)

        # Batch-row blocking: single full-array block when B <= 8 (no seq pad),
        # otherwise 8-row blocks (pad only a small batch remainder if needed).
        if B <= SUBLANE:
            rows, B_pad = B, B
        else:
            rows = SUBLANE
            B_pad = ((B + SUBLANE - 1) // SUBLANE) * SUBLANE
            if B_pad != B:
                # TODO(synk): handle the ragged last block in-kernel instead of padding.
                seq = jnp.pad(seq, ((0, B_pad - B), (0, 0), (0, 0)))
                vl_col = jnp.pad(vl_col, ((0, B_pad - B), (0, 0)))

        out_pad = fused_mask_pool_classifier(
            vl_col, seq, self.pool_w_mm, self.pool_b2d,
            self.cls_w_pad, self.cls_b_pad, rows=rows)                       # [B_pad, 128]
        return out_pad[:B, :self.num_classes]                                # [B, C]


if __name__ == "__main__":
    B, S, H, C, VOCAB = 2, 8, 32, 7, 50

    key = jax.random.PRNGKey(0)
    k_bert, k_cls, k_tok = jax.random.split(key, 3)

    bert = SyntheticBert(k_bert, VOCAB, H)
    model = BERTClassifier(bert, hidden_size=H, num_classes=C, dr_rate=None, key=k_cls)

    token_ids = jax.random.randint(k_tok, (B, S), 0, VOCAB, dtype=jnp.int32)
    valid_length = jnp.array([5, 8], dtype=jnp.int32)
    segment_ids = jnp.zeros((B, S), dtype=jnp.int32)

    log_probs = jax.block_until_ready(model.forward(token_ids, valid_length, segment_ids))

    assert log_probs.shape == (B, C)
    # log-softmax rows must sum (in prob space) to ~1
    assert jnp.allclose(jnp.sum(jnp.exp(log_probs), axis=-1), 1.0, atol=1e-5)

    # Pure-JAX reference that mirrors the PyTorch forward exactly.
    mask_ref = model.gen_attention_mask(token_ids, valid_length)
    _, pooler_ref = bert(token_ids, segment_ids.astype(jnp.int32), mask_ref)
    logits_ref = jnp.dot(pooler_ref, model.cls_w,
                         precision=lax.Precision.HIGHEST) + model.cls_b
    ref = jax.nn.log_softmax(logits_ref, axis=-1)
    assert jnp.allclose(log_probs, ref, atol=5e-3, rtol=5e-3)

    print("KERNEL_OK")
</pallas_src>

<mosaic_0001>
module attributes {stable_mosaic.version = 11 : i64} {
  func.func @_fused_kernel(%arg0: i32, %arg1: memref<2x1xi32, #tpu.memory_space<vmem>>, %arg2: memref<2x8x32xf32, #tpu.memory_space<vmem>>, %arg3: memref<32x32xf32, #tpu.memory_space<vmem>>, %arg4: memref<1x32xf32, #tpu.memory_space<vmem>>, %arg5: memref<32x128xf32, #tpu.memory_space<vmem>>, %arg6: memref<1x128xf32, #tpu.memory_space<vmem>>, %arg7: memref<2x128xf32, #tpu.memory_space<vmem>>) attributes {dimension_semantics = [#tpu.dimension_semantics<parallel>], iteration_bounds = array<i64: 1>, scalar_prefetch = 0 : i64, scratch_operands = 0 : i64, tpu.core_type = #tpu.core_type<tc>, window_params = [{transform_indices = @transform_0, window_bounds = array<i64: 2, 1>}, {transform_indices = @transform_1, window_bounds = array<i64: 2, 8, 32>}, {pipeline_mode = #tpu.pipeline_mode<synchronous>, transform_indices = @transform_2, window_bounds = array<i64: 32, 32>}, {pipeline_mode = #tpu.pipeline_mode<synchronous>, transform_indices = @transform_3, window_bounds = array<i64: 1, 32>}, {pipeline_mode = #tpu.pipeline_mode<synchronous>, transform_indices = @transform_4, window_bounds = array<i64: 32, 128>}, {pipeline_mode = #tpu.pipeline_mode<synchronous>, transform_indices = @transform_5, window_bounds = array<i64: 1, 128>}, {transform_indices = @transform_6, window_bounds = array<i64: 2, 128>}]} {
    %0 = tpu.iota {dimensions = array<i32: 1>} : vector<2x8xi32>
    %c0 = arith.constant 0 : index
    %c0_0 = arith.constant 0 : index
    %1 = vector.load %arg1[%c0, %c0_0] : memref<2x1xi32, #tpu.memory_space<vmem>>, vector<2x1xi32>
    %2 = vector.broadcast %1 : vector<2x1xi32> to vector<2x8xi32>
    %3 = arith.cmpi slt, %0, %2 : vector<2x8xi32>
    %4 = arith.extui %3 : vector<2x8xi1> to vector<2x8xi32>
    %5 = arith.sitofp %4 : vector<2x8xi32> to vector<2x8xf32>
    %cst = arith.constant dense<0.000000e+00> : vector<2xf32>
    %6 = vector.multi_reduction <add>, %5, %cst [1] : vector<2x8xf32> to vector<2xf32>
    %7 = vector.shape_cast %6 : vector<2xf32> to vector<2x1xf32>
    %cst_1 = arith.constant 1.000000e+00 : f32
    %8 = vector.broadcast %cst_1 : f32 to vector<2x1xf32>
    %9 = arith.maximumf %7, %8 : vector<2x1xf32>
    %10 = tpu.reciprocal %9 {approx = true} : vector<2x1xf32> -> vector<2x1xf32>
    %11 = vector.broadcast %10 : vector<2x1xf32> to vector<2x8xf32>
    %12 = arith.mulf %5, %11 : vector<2x8xf32>
    %c0_2 = arith.constant 0 : index
    %c0_3 = arith.constant 0 : index
    %c0_4 = arith.constant 0 : index
    %13 = vector.load %arg2[%c0_2, %c0_3, %c0_4] : memref<2x8x32xf32, #tpu.memory_space<vmem>>, vector<2x8x32xf32>
    %14 = vector.shape_cast %12 : vector<2x8xf32> to vector<2x8x1xf32>
    %15 = vector.broadcast %14 : vector<2x8x1xf32> to vector<2x8x32xf32>
    %16 = arith.mulf %13, %15 : vector<2x8x32xf32>
    %cst_5 = arith.constant dense<0.000000e+00> : vector<2x32xf32>
    %17 = vector.multi_reduction <add>, %16, %cst_5 [1] : vector<2x8x32xf32> to vector<2x32xf32>
    %c0_6 = arith.constant 0 : index
    %c0_7 = arith.constant 0 : index
    %18 = vector.load %arg3[%c0_6, %c0_7] : memref<32x32xf32, #tpu.memory_space<vmem>>, vector<32x32xf32>
    %cst_8 = arith.constant dense<0.000000e+00> : vector<2x32xf32>
    %19 = tpu.matmul %17, %18, %cst_8 {dimension_numbers = #tpu.dot_dimension_numbers<[1], [0], [0], [1], [0, 0, 1, 1], [], []>} : vector<2x32xf32>, vector<32x32xf32>, vector<2x32xf32> -> vector<2x32xf32>
    %c0_9 = arith.constant 0 : index
    %c0_10 = arith.constant 0 : index
    %20 = vector.load %arg4[%c0_9, %c0_10] : memref<1x32xf32, #tpu.memory_space<vmem>>, vector<1x32xf32>
    %21 = vector.broadcast %20 : vector<1x32xf32> to vector<2x32xf32>
    %22 = arith.addf %19, %21 : vector<2x32xf32>
    %23 = math.tanh %22 : vector<2x32xf32>
    %c0_11 = arith.constant 0 : index
    %c0_12 = arith.constant 0 : index
    %24 = vector.load %arg5[%c0_11, %c0_12] : memref<32x128xf32, #tpu.memory_space<vmem>>, vector<32x128xf32>
    %cst_13 = arith.constant dense<0.000000e+00> : vector<2x128xf32>
    %25 = tpu.matmul %23, %24, %cst_13 {dimension_numbers = #tpu.dot_dimension_numbers<[1], [0], [0], [1], [0, 0, 1, 1], [], []>} : vector<2x32xf32>, vector<32x128xf32>, vector<2x128xf32> -> vector<2x128xf32>
    %c0_14 = arith.constant 0 : index
    %c0_15 = arith.constant 0 : index
    %26 = vector.load %arg6[%c0_14, %c0_15] : memref<1x128xf32, #tpu.memory_space<vmem>>, vector<1x128xf32>
    %27 = vector.broadcast %26 : vector<1x128xf32> to vector<2x128xf32>
    %28 = arith.addf %25, %27 : vector<2x128xf32>
    %cst_16 = arith.constant dense<0xFF800000> : vector<2xf32>
    %29 = vector.multi_reduction <maximumf>, %28, %cst_16 [1] : vector<2x128xf32> to vector<2xf32>
    %30 = vector.shape_cast %29 : vector<2xf32> to vector<2x1xf32>
    %31 = vector.broadcast %30 : vector<2x1xf32> to vector<2x128xf32>
    %32 = arith.subf %28, %31 : vector<2x128xf32>
    %33 = math.exp %32 : vector<2x128xf32>
    %cst_17 = arith.constant dense<0.000000e+00> : vector<2xf32>
    %34 = vector.multi_reduction <add>, %33, %cst_17 [1] : vector<2x128xf32> to vector<2xf32>
    %35 = vector.shape_cast %34 : vector<2xf32> to vector<2x1xf32>
    %36 = math.log %35 : vector<2x1xf32>
    %37 = vector.broadcast %36 : vector<2x1xf32> to vector<2x128xf32>
    %38 = arith.subf %32, %37 : vector<2x128xf32>
    %c0_18 = arith.constant 0 : index
    %c0_19 = arith.constant 0 : index
    %39 = vector.load %arg7[%c0_18, %c0_19] : memref<2x128xf32, #tpu.memory_space<vmem>>, vector<2x128xf32>
    tpu.vector_store %arg7[%c0_18, %c0_19], %38 {strides = array<i32>} : memref<2x128xf32, #tpu.memory_space<vmem>>, vector<2x128xf32>,
    return
  }
  func.func @transform_0(%arg0: i32) -> (i32, i32) {
    %c0_i32 = arith.constant 0 : i32
    %c0_i32_0 = arith.constant 0 : i32
    return %arg0, %c0_i32 : i32, i32
  }
  func.func @transform_1(%arg0: i32) -> (i32, i32, i32) {
    %c0_i32 = arith.constant 0 : i32
    %c0_i32_0 = arith.constant 0 : i32
    %c0_i32_1 = arith.constant 0 : i32
    return %arg0, %c0_i32, %c0_i32_0 : i32, i32, i32
  }
  func.func @transform_2(%arg0: i32) -> (i32, i32) {
    %c0_i32 = arith.constant 0 : i32
    %c0_i32_0 = arith.constant 0 : i32
    %c0_i32_1 = arith.constant 0 : i32
    return %c0_i32, %c0_i32_0 : i32, i32
  }
  func.func @transform_3(%arg0: i32) -> (i32, i32) {
    %c0_i32 = arith.constant 0 : i32
    %c0_i32_0 = arith.constant 0 : i32
    %c0_i32_1 = arith.constant 0 : i32
    return %c0_i32, %c0_i32_0 : i32, i32
  }
  func.func @transform_4(%arg0: i32) -> (i32, i32) {
    %c0_i32 = arith.constant 0 : i32
    %c0_i32_0 = arith.constant 0 : i32
    %c0_i32_1 = arith.constant 0 : i32
    return %c0_i32, %c0_i32_0 : i32, i32
  }
  func.func @transform_5(%arg0: i32) -> (i32, i32) {
    %c0_i32 = arith.constant 0 : i32
    %c0_i32_0 = arith.constant 0 : i32
    %c0_i32_1 = arith.constant 0 : i32
    return %c0_i32, %c0_i32_0 : i32, i32
  }
  func.func @transform_6(%arg0: i32) -> (i32, i32) {
    %c0_i32 = arith.constant 0 : i32
    %c0_i32_0 = arith.constant 0 : i32
    return %arg0, %c0_i32 : i32, i32
  }
}

</mosaic_0001>

<bundles_post_ra>
// kernel: tpu_custom_call.1
= control target key start
LH: loop header
LB: loop body
LE: loop exit
PB: predicated region body
PF: predicated region fallthrough
CT: control target
= control target key end

     0   :  { %11 = vsyncpa [#allocation3], 0  ;;  %s537_s0 = inlined_call_operand.vmem [shape: s32[2,1], index: 0, kind: input, shape index: {}]   ;;  %s538_s1 = inlined_call_operand.hbm [shape: f32[2,8,32], index: 1, kind: input, shape index: {}]   ;;  %s539_s2 = inlined_call_operand.hbm [shape: f32[32,32], index: 2, kind: input, shape index: {}]   ;;  %s540_s3 = inlined_call_operand.vmem [shape: f32[1,32], index: 3, kind: input, shape index: {}]   ;;  %s541_s4 = inlined_call_operand.hbm [shape: f32[32,128], index: 4, kind: input, shape index: {}]   ;;  %s542_s5 = inlined_call_operand.vmem [shape: f32[1,128], index: 5, kind: input, shape index: {}]   ;;  %s543_s6 = inlined_call_operand.hbm [shape: f32[2,128], index: 6, kind: output, shape index: {}]  }
   0x1   :  { %12 = vsyncpa [#allocation6], 0 }
   0x2   :  { %13 = vsyncpa [#allocation4], 0  ;;  %s457_s21 = smov [#allocation5]   ;;  %s458_s23 = smov [#allocation2]  }
   0x3   :  { %s33_s22 = sshll.u32 %s457_s21, 4  ;;  %s21_s24 = sshll.u32 %s458_s23, 4  ;;  %s34_s22 = int_to_ptr.vmem [resolvable:$true] %s33_s22  ;;  %s22_s24 = int_to_ptr.vmem [resolvable:$true] %s21_s24 }
   0x4   :  { %s379_s25 = scalar_lea.vmem %s34_s22, 512  ;;  %p384_p1 = scmp.lt.s32.totalorder %s34_s22, %s34_s22 }
   0x5   :  { %p380_p0 = scmp.ne.s32.totalorder %s34_s22, %s379_s25  ;;  %p385_p2 = scmp.lt.s32.totalorder %s379_s25, %s379_s25 }
   0x7   :  { %p386_p3 = por %p385_p2, %p384_p1 }
   0x9   :  { %p387_p4 = pnand %p386_p3, %p380_p0 }
   0xb   :  { %390 = shalt.err (!%p387_p4)
}
   0xc   :  { %s459_s26 = smov 128   ;;  %s460_s27 = smov 8  }
   0xd   :  { %39 = dma.hbm_to_vmem [thread:$0]  %s539_s2, 512, %s34_s22, [#allocation6], %s459_s26, %s459_s26, %s460_s27  }
   0xe   :  { %s399_s30 = scalar_lea.vmem %s22_s24, 256  ;;  %p404_p6 = scmp.lt.s32.totalorder %s22_s24, %s22_s24 }
   0xf   :  { %p400_p5 = scmp.ne.s32.totalorder %s22_s24, %s399_s30  ;;  %p405_p7 = scmp.lt.s32.totalorder %s399_s30, %s399_s30 }
  0x11   :  { %p406_p8 = por %p405_p7, %p404_p6 }
  0x13   :  { %p407_p9 = pnand %p406_p8, %p400_p5 }
  0x15   :  { %410 = shalt.err (!%p407_p9)
}
  0x16   :  { %27 = dma.hbm_to_vmem [thread:$0]  %s538_s1, 256, %s22_s24, [#allocation3], %s459_s26, %s459_s26, %s460_s27  }
  0x17   :  { %s461_s9 = smov [#allocation7]  }
  0x18   :  { %s47_s10 = sshll.u32 %s461_s9, 4  ;;  %s48_s10 = int_to_ptr.vmem [resolvable:$true] %s47_s10 }
  0x19   :  { %s419_s11 = scalar_lea.vmem %s48_s10, 512  ;;  %p424_p11 = scmp.lt.s32.totalorder %s48_s10, %s48_s10 }
  0x1a   :  { %p420_p10 = scmp.ne.s32.totalorder %s48_s10, %s419_s11  ;;  %p425_p12 = scmp.lt.s32.totalorder %s419_s11, %s419_s11 }
  0x1c   :  { %p426_p13 = por %p425_p12, %p424_p11 }
  0x1e   :  { %p427_p0 = pnand %p426_p13, %p420_p10 }
  0x20   :  { %430 = shalt.err (!%p427_p0)
}
  0x21   :  { %53 = dma.hbm_to_vmem [thread:$0]  %s541_s4, 512, %s48_s10, [#allocation6], %s459_s26, %s459_s26, %s460_s27  }
  0x22   :  { %451 = dma.done.wait [#allocation3], 256  }
  0x23   :  { %452 = vsyncadd [#allocation3], 4294967040 }
  0x24   :  { %453 = dma.done.wait [#allocation6], 1024  }
  0x25   :  { %454 = vsyncadd [#allocation6], 4294966272  ;;  %v462_v0 = vmov 0   ;;  %v463_v1 = vmov 0.0   ;;  %v67_v2 = vld [vmem:[%s537_s0] sm:$0x3]  ;;  %v65_v3 = vlaneseq }
  0x26   :  { %362 = vset.pattern.permute.xlu0 %v462_v0  ;;  %331 = vmatprep.subr.mxu0 %v463_v1  ;;  %vm74_vm0 = vcmask 58368   ;;  %v117_v16 = vld [vmem:[#allocation5 + $0x18] sm:$0xff]  ;;  %v116_v17 = vld [vmem:[#allocation5 + $0x10] sm:$0xff]  ;;  %v115_v19 = vld [vmem:[#allocation5 + $0x8] sm:$0xff]  ;;  %vm464_vm2 = vmmov 0   ;;  %vm99_vm3 = vcmask 261120  }
  0x27   :  { %342 = vmatprep.subr.mxu1 %v463_v1  ;;  %69 = vperm.xlu0 %362, %v67_v2   ;;  %v66_v4 = vand.u32 127, %v65_v3  ;;  %v84_v10 = vshrl.u32 %v65_v3, 7  ;;  %v114_v20 = vld [vmem:[#allocation5] sm:$0xff]  ;;  %v81_v21 = vld [vmem:[#allocation2] sm:$0xff]  ;;  %v82_v24 = vld [vmem:[#allocation2 + $0x8] sm:$0xff]  ;;  %vm127_vm4 = vcmask 1041409  }
  0x28   :  { %332 = vmatpush3.msra.mxu0 %v117_v16  ;;  %339 = vmatprep.mubr.msk.f32.mxu0 %vm464_vm2, %v463_v1  ;;  %v205_v42 = vld [vmem:[#allocation7 + $0x18] sm:$0xff]  ;;  %v204_v43 = vld [vmem:[#allocation7 + $0x10] sm:$0xff]  ;;  %v203_v44 = vld [vmem:[#allocation7 + $0x8] sm:$0xff]  ;;  %vm286_vm5 = vcmask 1041408  }
  0x29   :  { %v85_v11 = vsub.s32 0, %v84_v10  ;;  %v92_v15 = vsub.s32 1, %v84_v10  ;;  %333 = vmatprep.subr.mxu0 %v463_v1  ;;  %350 = vmatprep.mubr.msk.f32.mxu1 %vm464_vm2, %v463_v1  ;;  %v202_v45 = vld [vmem:[#allocation7] sm:$0xff]  ;;  %v317_v46 = vld [vmem:[%s540_s3] ss:$0 sm:$0xff]  ;;  %s465_s3 = smov [#allocation8]  }
  0x2a   :  { %334 = vmatpush3.msra.mxu0 %v116_v17  ;;  %343 = vmatpush3.msra.mxu1 %v205_v42  ;;  %v319_v51 = vld [vmem:[%s542_s5] ss:$0 sm:$0xff]  ;;  %s306_s16 = sshll.u32 %s465_s3, 4  ;;  %s307_s16 = int_to_ptr.vmem [resolvable:$true] %s306_s16 }
  0x2b   :  { %335 = vmatprep.subr.mxu0 %v463_v1  ;;  %344 = vmatprep.subr.mxu1 %v463_v1  ;;  %s431_s5 = scalar_lea.vmem %s307_s16, 32  ;;  %p436_p2 = scmp.lt.s32.totalorder %s307_s16, %s307_s16 }
  0x2c   :  { %336 = vmatpush3.msra.mxu0 %v115_v19  ;;  %345 = vmatpush3.msra.mxu1 %v204_v43  ;;  %p432_p1 = scmp.ne.s32.totalorder %s307_s16, %s431_s5  ;;  %p437_p3 = scmp.lt.s32.totalorder %s431_s5, %s431_s5 }
  0x2d   :  { %337 = vmatprep.subr.mxu0 %v463_v1  ;;  %346 = vmatprep.subr.mxu1 %v463_v1 }
  0x2e   :  { %338 = vmatpush3.msra.mxu0 %v114_v20  ;;  %347 = vmatpush3.msra.mxu1 %v203_v44  ;;  %p438_p4 = por %p437_p3, %p436_p2 }
  0x2f   :  { %348 = vmatprep.subr.mxu1 %v463_v1 }
  0x30   :  { %349 = vmatpush3.msra.mxu1 %v202_v45  ;;  %p439_p5 = pnand %p438_p4, %p432_p1 }
  0xa2   :  { %v70_v5 = vpop.permute.xlu0 %69 }
  0xa3   :  { %vm71_vm1 = vcmp.lt.s32.totalorder %v66_v4, %v70_v5 }
  0xa4   :  { %v316_v6 = vsel %vm71_vm1, 1.0, %v463_v1 }
  0xa5   :  { %v75_v7 = vsel %vm74_vm0, %v316_v6, 0.0 }
  0xa6   :  { %76 = vadd.xlane.f32.xlu0 %v75_v7 }
 0x12f   :  { %v77_v8 = vpop.xlane.xlu0 %76 }
 0x130   :  { %v78_v9 = vmax.f32 %v77_v8, 1.0 }
 0x132   :  { %363 = vrcp.f32 %v78_v9 }
 0x13f   :  { %v364_v12 = vpop.eup %363 }
 0x140   :  { %v80_v13 = vmul.f32 %v364_v12, %v316_v6 }
 0x142   :  { %v86_v14 = vrot.slane %v80_v13, %v85_v11  ;;  %v93_v18 = vrot.slane %v80_v13, %v92_v15 }
 0x144   :  { %88 = vbcast.lane.b32.xlu1 %v86_v14, 256 }
 0x148   :  { %95 = vbcast.lane.b32.xlu1 %v93_v18, 256 }
 0x1b6   :  { %v89_v22 = vpop.permute.xlu1 %88 }
 0x1b7   :  { %v97_v23 = vmul.f32 %v89_v22, %v81_v21 }
 0x1b9   :  { %v100_v25 = vsel %vm99_vm3, %v97_v23, 0.0 }
 0x1ba   :  { %v101_v26 = vrot.slane %v100_v25, 4  ;;  %v96_v27 = vpop.permute.xlu1 %95 }
 0x1bb   :  { %v98_v28 = vmul.f32 %v96_v27, %v82_v24 }
 0x1bc   :  { %v102_v29 = vadd.f32 %v101_v26, %v100_v25 }
 0x1bd   :  { %v107_v30 = vsel %vm99_vm3, %v98_v28, 0.0 }
 0x1be   :  { %v103_v31 = vrot.slane %v102_v29, 2  ;;  %v108_v32 = vrot.slane %v107_v30, 4 }
 0x1c0   :  { %v104_v33 = vadd.f32 %v103_v31, %v102_v29  ;;  %v109_v34 = vadd.f32 %v108_v32, %v107_v30 }
 0x1c2   :  { %v110_v35 = vrot.slane %v109_v34, 2  ;;  %v105_v36 = vrot.slane %v104_v33, 1 }
 0x1c4   :  { %v111_v37 = vadd.f32 %v110_v35, %v109_v34  ;;  %v106_v39 = vadd.f32 %v105_v36, %v104_v33 }
 0x1c6   :  { %v112_v38 = vrot.slane %v111_v37, 1 }
 0x1c8   :  { %v113_v40 = vadd.f32 %v112_v38, %v111_v37 }
 0x1ca   :  { %v128_v41 = vsel %vm127_vm4, %v113_v40, %v106_v39 }
 0x1cb   :  { %340 = vmatmul.mubr.msk.f32.vlgmr.msra.gmra.mxu0 %vm99_vm3, %v128_v41 }
 0x28b   :  { %v197_v47 = vpop.f32.mrf.mxu0 }
 0x28c   :  { %v198_v48 = vadd.f32 %v317_v46, %v197_v47 }
 0x28d   :  { %v341_v49 = vpop.f32.mrf.mxu0 }
 0x28e   :  { %365 = vtanh.f32 %v198_v48 }
 0x29b   :  { %v366_v50 = vpop.eup %365 }
 0x29c   :  { %351 = vmatmul.mubr.msk.f32.vlgmr.msra.gmra.mxu1 %vm99_vm3, %v366_v50 }
 0x35c   :  { %v282_v52 = vpop.f32.mrf.mxu1 }
 0x35d   :  { %v283_v53 = vadd.f32 %v319_v51, %v282_v52 }
 0x35e   :  { %v352_v54 = vpop.f32.mrf.mxu1 }
 0x35f   :  { %v287_v55 = vsel %vm286_vm5, %v283_v53, -inf }
 0x360   :  { %288 = vmax.xlane.f32.xlu1 %v287_v55 }
 0x3e9   :  { %v289_v56 = vpop.xlane.xlu1 %288 }
 0x3ea   :  { %v290_v57 = vsub.f32 %v283_v53, %v289_v56 }
 0x3ec   :  { %v291_v58 = vmul.f32 1.442695, %v290_v57 }
 0x3ee   :  { %367 = vpow2.f32 %v291_v58 }
 0x3fb   :  { %v368_v59 = vpop.eup %367 }
 0x3fc   :  { %v293_v60 = vsel %vm286_vm5, %v368_v59, 0.0 }
 0x3fd   :  { %294 = vadd.xlane.f32.xlu0 %v293_v60 }
 0x486   :  { %v295_v61 = vpop.xlane.xlu0 %294 }
 0x487   :  { %369 = vlog2.f32 %v295_v61 }
 0x494   :  { %v370_v62 = vpop.eup %369 }
 0x495   :  { %v297_v63 = vmul.f32 0.6931472, %v370_v62 }
 0x497   :  { %v298_v0 = vsub.f32 %v290_v57, %v297_v63 }
 0x499   :  { %299 = vst [vmem:[#allocation8] sm:$0x3] %v298_v0 }
 0x49a   :  { %442 = shalt.err (!%p439_p5)
}
 0x49b   :  { %309 = dma.vmem_to_hbm [thread:$0]  %s307_s16, 32, %s543_s6, [#allocation4]  }
 0x49c   :  { %455 = dma.done.wait [#allocation4], 32  }
 0x49d   :  { %456 = vsyncadd [#allocation4], 4294967264 }
 0x49e   :  { %313 = vsyncpa [#allocation3], 1 }
 0x49f   :  { %314 = vsyncpa [#allocation6], 1 }
 0x4a0   :  { %315 = vsyncpa [#allocation4], 1 }

</bundles_post_ra>
